<compile_context>
chip_gen: v7x
topology: tpu7x:2x2x1
jax: 0.10.0
libtpu: 0.0.40
codegen_flags: <defaults>
</compile_context>

<pallas_src>
import functools

import jax
import jax.numpy as jnp
from jax.experimental import pallas as pl
from jax.experimental.pallas import tpu as pltpu

# Safe on v5e/v6e (128 MiB physical) and v7x (64 MiB per TC).  On v5e/v6e this
# could be raised to 64-96 MiB together with larger block_q.
VMEM_LIMIT_BYTES = 48 * 1024 * 1024


def _pick_block_q(n, block_q):
    """Row-block size: multiple of 8; >=2 grid steps when possible (v7x 2 TCs)."""
    if n <= 8:
        return n
    if n <= block_q:
        half = (n + 1) // 2
        return min(n, ((half + 7) // 8) * 8)
    return block_q


# --------------------------------------------------------------------------- #
# Kernel 1: fused multi-head projection  (Wh, f1, f2) — computed once per layer
# --------------------------------------------------------------------------- #
def _gat_project_kernel(h_ref, w_ref, a1_ref, a2_ref, wh_ref, f1_ref, f2_ref,
                        *, num_heads, f_out):
    """Row block of: Wh = h @ W_cat, f1 = Wh·a1 per head, f2 = Wh·a2 per head.

    h_ref:  (bq, Fin)      node-feature row block
    w_ref:  (Fin, H*F)     all head weights concatenated column-wise
    a1_ref: (H, F)         a[:F] per head
    a2_ref: (H, F)         a[F:] per head
    wh_ref: (bq, H*F)      projected features (all heads, concatenated)
    f1_ref: (bq, H)        query-side attention logits per head
    f2_ref: (bq, H)        key-side attention logits per head
    """
    w_bf = w_ref[...].astype(jnp.bfloat16)
    wh = jnp.dot(h_ref[...].astype(jnp.bfloat16), w_bf,
                 preferred_element_type=jnp.float32)            # (bq, H*F) f32

    bq = wh.shape[0]
    wh3 = wh.reshape(bq, num_heads, f_out)                      # (bq, H, F)
    # One fused pass over all heads (no per-head 16-lane slices), f32 math.
    f1_ref[...] = jnp.sum(wh3 * a1_ref[...][None, :, :], axis=2)  # (bq, H)
    f2_ref[...] = jnp.sum(wh3 * a2_ref[...][None, :, :], axis=2)  # (bq, H)
    wh_ref[...] = wh.astype(wh_ref.dtype)


# --------------------------------------------------------------------------- #
# Kernel 2: fused multi-head attention (mask + softmax + att@Wh + ELU)
# --------------------------------------------------------------------------- #
def _gat_attention_kernel(wh_ref, f1_ref, f2t_ref, adj_ref, out_ref,
                          *, num_heads, f_out, alpha, final_log_softmax,
                          block_q):
    """One query-row block of the attention stage for ALL heads.

    wh_ref:  (N, H*F)   projected node features (grid-invariant)
    f1_ref:  (bq, H)    query-side logits, row block
    f2t_ref: (H, N)     key-side logits, transposed (grid-invariant)
    adj_ref: (bq, N)    adjacency rows (mask built inline: adj>0 or i==j)
    out_ref: (bq, H*F)  concatenated per-head outputs (single full-width store)
    """
    i = pl.program_id(0)
    adj = adj_ref[...]                                          # (bq, N) f32
    bq, n = adj.shape
    row = jax.lax.broadcasted_iota(jnp.int32, (bq, n), 0) + i * block_q
    col = jax.lax.broadcasted_iota(jnp.int32, (bq, n), 1)
    # Sign pattern of D^-1/2 (adj + I) D^-1/2 for a non-negative adjacency.
    keep = jnp.logical_or(adj > 0.0, row == col)
    neg = jnp.float32(-9.0e15)

    f1 = f1_ref[...]                                            # (bq, H)
    f2t = f2t_ref[...]                                          # (H, N)
    wh_bf = wh_ref[...].astype(jnp.bfloat16)                    # (N, H*F)

    parts = []
    for hd in range(num_heads):                                 # static, small unroll
        lo = hd * f_out
        e = f1[:, hd:hd + 1] + f2t[hd:hd + 1, :]                # (bq, N)
        e = jnp.where(e > 0, e, alpha * e)                      # LeakyReLU(alpha)

        # Masked row softmax
        logits = jnp.where(keep, e, neg)
        m = jnp.max(logits, axis=1, keepdims=True)
        p = jnp.exp(logits - m)
        s = jnp.sum(p, axis=1, keepdims=True)
        att = p * pl.reciprocal(s, approx=True)                 # EUP vrcp (free slot)
        # (attention dropout omitted: eval-mode semantics)

        hp = jnp.dot(att.astype(jnp.bfloat16), wh_bf[:, lo:lo + f_out],
                     preferred_element_type=jnp.float32)        # (bq, F)

        # ELU, clamped so the discarded branch never produces inf
        parts.append(jnp.where(hp > 0, hp, jnp.exp(jnp.minimum(hp, 0.0)) - 1.0))

    out = parts[0] if num_heads == 1 else jnp.concatenate(parts, axis=1)

    if final_log_softmax:
        # Only used by the out layer (num_heads == 1): log_softmax(dim=1).
        m2 = jnp.max(out, axis=1, keepdims=True)
        z = out - m2
        out = z - jnp.log(jnp.sum(jnp.exp(z), axis=1, keepdims=True))

    out_ref[...] = out.astype(out_ref.dtype)                    # one lane-dense store


# --------------------------------------------------------------------------- #
# Fused multi-head GraphAttentionLayer (eval mode)
# --------------------------------------------------------------------------- #
def gat_layer(h, w_cat, a1, a2, adj, *, num_heads, f_out, alpha,
              final_log_softmax=False, block_q=256):
    assert num_heads == 1 or not final_log_softmax
    n, f_in = h.shape
    hf = num_heads * f_out
    bq = _pick_block_q(n, block_q)
    grid = (pl.cdiv(n, bq),)
    cparams = pltpu.CompilerParams(dimension_semantics=("parallel",),
                                   vmem_limit_bytes=VMEM_LIMIT_BYTES)

    # --- projection + logit vectors (grid-invariant work hoisted here) ---
    proj = functools.partial(_gat_project_kernel, num_heads=num_heads,
                             f_out=f_out)
    wh, f1, f2 = pl.pallas_call(
        proj,
        out_shape=(jax.ShapeDtypeStruct((n, hf), jnp.float32),
                   jax.ShapeDtypeStruct((n, num_heads), jnp.float32),
                   jax.ShapeDtypeStruct((n, num_heads), jnp.float32)),
        grid=grid,
        in_specs=[
            pl.BlockSpec((bq, f_in), lambda i: (i, 0)),           # h rows
            pl.BlockSpec((f_in, hf), lambda i: (0, 0)),           # W (all heads)
            pl.BlockSpec((num_heads, f_out), lambda i: (0, 0)),   # a[:F] per head
            pl.BlockSpec((num_heads, f_out), lambda i: (0, 0)),   # a[F:] per head
        ],
        out_specs=(pl.BlockSpec((bq, hf), lambda i: (i, 0)),
                   pl.BlockSpec((bq, num_heads), lambda i: (i, 0)),
                   pl.BlockSpec((bq, num_heads), lambda i: (i, 0))),
        compiler_params=cparams,
    )(h, w_cat, a1, a2)

    f2t = f2.T  # (H, N) — tiny wrapper-side layout plumbing (no per-block transpose)

    # --- attention stage (TODO: key-dim tiling + online softmax for huge N) ---
    attn = functools.partial(_gat_attention_kernel, num_heads=num_heads,
                             f_out=f_out, alpha=alpha,
                             final_log_softmax=final_log_softmax, block_q=bq)
    return pl.pallas_call(
        attn,
        out_shape=jax.ShapeDtypeStruct((n, hf), jnp.float32),
        grid=grid,
        in_specs=[
            pl.BlockSpec((n, hf), lambda i: (0, 0)),              # Wh (resident)
            pl.BlockSpec((bq, num_heads), lambda i: (i, 0)),      # f1 rows
            pl.BlockSpec((num_heads, n), lambda i: (0, 0)),       # f2^T (resident)
            pl.BlockSpec((bq, n), lambda i: (i, 0)),              # adjacency rows
        ],
        out_specs=pl.BlockSpec((bq, hf), lambda i: (i, 0)),
        compiler_params=cparams,
    )(wh, f1, f2t, adj)


# --------------------------------------------------------------------------- #
# GAT forward (eval mode)
# --------------------------------------------------------------------------- #
def gat_forward(x, adj, params, *, alpha):
    """GAT.forward: heads -> concat -> out layer -> ELU -> log_softmax."""
    # x = dropout(x) -> identity in eval mode
    heads_w, heads_a = zip(*params["heads"])
    f_out = heads_w[0].shape[1]
    num_heads = len(heads_w)
    # Parameter plumbing (layout only): stack head params for the fused kernels.
    w_cat = jnp.concatenate(heads_w, axis=1)                     # (Fin, H*F)
    a1 = jnp.stack([a[:f_out, 0] for a in heads_a], axis=0)      # (H, F)
    a2 = jnp.stack([a[f_out:, 0] for a in heads_a], axis=0)      # (H, F)

    x = gat_layer(x, w_cat, a1, a2, adj, num_heads=num_heads, f_out=f_out,
                  alpha=alpha, final_log_softmax=False)          # (N, H*F)
    # x = dropout(x) -> identity in eval mode

    w_out, a_out = params["out"]
    fo = w_out.shape[1]
    a1o = a_out[:fo, 0].reshape(1, fo)
    a2o = a_out[fo:, 0].reshape(1, fo)
    # out_att (concat=False) + F.elu + F.log_softmax(dim=1), fused in-kernel
    return gat_layer(x, w_out, a1o, a2o, adj, num_heads=1, f_out=fo,
                     alpha=alpha, final_log_softmax=True)


# --------------------------------------------------------------------------- #
# Parameter init (Xavier uniform, gain=1.414, matching the PyTorch module)
# --------------------------------------------------------------------------- #
def xavier_uniform(key, shape, gain):
    fan_in, fan_out = shape[0], shape[1]
    bound = gain * (6.0 / (fan_in + fan_out)) ** 0.5
    return jax.random.uniform(key, shape, jnp.float32, -bound, bound)


def init_gat_params(key, nfeat, nhid, nheads, gain=1.414):
    keys = jax.random.split(key, 2 * nheads + 2)
    heads = []
    for i in range(nheads):
        W = xavier_uniform(keys[2 * i], (nfeat, nhid), gain)
        a = xavier_uniform(keys[2 * i + 1], (2 * nhid, 1), gain)
        heads.append((W, a))
    W_out = xavier_uniform(keys[-2], (nhid * nheads, nhid), gain)
    a_out = xavier_uniform(keys[-1], (2 * nhid, 1), gain)
    return {"heads": heads, "out": (W_out, a_out)}


if __name__ == "__main__":
    # Small, deterministic problem consistent with GAT(nfeat, nhid, dropout, alpha, nheads)
    N, nfeat, nhid, nheads = 16, 32, 16, 4
    alpha = 0.2
    dropout = 0.2  # unused: eval-mode (identity) dropout

    key = jax.random.PRNGKey(0)
    k_x, k_adj, k_par = jax.random.split(key, 3)

    x = jax.random.normal(k_x, (N, nfeat), jnp.float32)
    adj = (jax.random.uniform(k_adj, (N, N)) < 0.3).astype(jnp.float32)
    adj = jnp.maximum(adj, adj.T)  # symmetric binary adjacency

    params = init_gat_params(k_par, nfeat, nhid, nheads)

    out = gat_forward(x, adj, params, alpha=alpha)
    out = jax.block_until_ready(out)

    assert out.shape == (N, nhid)
    assert bool(jnp.all(jnp.isfinite(out)))
    # rows of exp(log_softmax) must sum to ~1
    assert bool(jnp.allclose(jnp.sum(jnp.exp(out), axis=1), 1.0, atol=1e-4))

    print("KERNEL_OK")
</pallas_src>

<mosaic_0001>
module attributes {stable_mosaic.version = 11 : i64} {
  func.func @_gat_project_kernel(%arg0: i32, %arg1: memref<8x32xf32, #tpu.memory_space<vmem>>, %arg2: memref<32x64xf32, #tpu.memory_space<vmem>>, %arg3: memref<4x16xf32, #tpu.memory_space<vmem>>, %arg4: memref<4x16xf32, #tpu.memory_space<vmem>>, %arg5: memref<8x64xf32, #tpu.memory_space<vmem>>, %arg6: memref<8x4xf32, #tpu.memory_space<vmem>>, %arg7: memref<8x4xf32, #tpu.memory_space<vmem>>) attributes {dimension_semantics = [#tpu.dimension_semantics<parallel>], iteration_bounds = array<i64: 2>, scalar_prefetch = 0 : i64, scratch_operands = 0 : i64, tpu.core_type = #tpu.core_type<tc>, window_params = [{transform_indices = @transform_0, window_bounds = array<i64: 8, 32>}, {pipeline_mode = #tpu.pipeline_mode<synchronous>, transform_indices = @transform_1, window_bounds = array<i64: 32, 64>}, {pipeline_mode = #tpu.pipeline_mode<synchronous>, transform_indices = @transform_2, window_bounds = array<i64: 4, 16>}, {pipeline_mode = #tpu.pipeline_mode<synchronous>, transform_indices = @transform_3, window_bounds = array<i64: 4, 16>}, {transform_indices = @transform_4, window_bounds = array<i64: 8, 64>}, {transform_indices = @transform_5, window_bounds = array<i64: 8, 4>}, {transform_indices = @transform_6, window_bounds = array<i64: 8, 4>}]} {
    %c0 = arith.constant 0 : index
    %c0_0 = arith.constant 0 : index
    %0 = vector.load %arg2[%c0, %c0_0] : memref<32x64xf32, #tpu.memory_space<vmem>>, vector<32x64xf32>
    %1 = arith.truncf %0 : vector<32x64xf32> to vector<32x64xbf16>
    %c0_1 = arith.constant 0 : index
    %c0_2 = arith.constant 0 : index
    %2 = vector.load %arg1[%c0_1, %c0_2] : memref<8x32xf32, #tpu.memory_space<vmem>>, vector<8x32xf32>
    %3 = arith.truncf %2 : vector<8x32xf32> to vector<8x32xbf16>
    %cst = arith.constant dense<0.000000e+00> : vector<8x64xf32>
    %4 = tpu.matmul %3, %1, %cst {dimension_numbers = #tpu.dot_dimension_numbers<[1], [0], [0], [1], [0, 0, 1, 1], [], []>} : vector<8x32xbf16>, vector<32x64xbf16>, vector<8x64xf32> -> vector<8x64xf32>
    %5 = vector.shape_cast %4 : vector<8x64xf32> to vector<8x4x16xf32>
    %c0_3 = arith.constant 0 : index
    %c0_4 = arith.constant 0 : index
    %6 = vector.load %arg3[%c0_3, %c0_4] : memref<4x16xf32, #tpu.memory_space<vmem>>, vector<4x16xf32>
    %7 = vector.shape_cast %6 : vector<4x16xf32> to vector<1x4x16xf32>
    %8 = vector.broadcast %7 : vector<1x4x16xf32> to vector<8x4x16xf32>
    %9 = arith.mulf %5, %8 : vector<8x4x16xf32>
    %cst_5 = arith.constant dense<0.000000e+00> : vector<8x4xf32>
    %10 = vector.multi_reduction <add>, %9, %cst_5 [2] : vector<8x4x16xf32> to vector<8x4xf32>
    %c0_6 = arith.constant 0 : index
    %c0_7 = arith.constant 0 : index
    %11 = vector.load %arg6[%c0_6, %c0_7] : memref<8x4xf32, #tpu.memory_space<vmem>>, vector<8x4xf32>
    tpu.vector_store %arg6[%c0_6, %c0_7], %10 {strides = array<i32>} : memref<8x4xf32, #tpu.memory_space<vmem>>, vector<8x4xf32>,
    %c0_8 = arith.constant 0 : index
    %c0_9 = arith.constant 0 : index
    %12 = vector.load %arg4[%c0_8, %c0_9] : memref<4x16xf32, #tpu.memory_space<vmem>>, vector<4x16xf32>
    %13 = vector.shape_cast %12 : vector<4x16xf32> to vector<1x4x16xf32>
    %14 = vector.broadcast %13 : vector<1x4x16xf32> to vector<8x4x16xf32>
    %15 = arith.mulf %5, %14 : vector<8x4x16xf32>
    %cst_10 = arith.constant dense<0.000000e+00> : vector<8x4xf32>
    %16 = vector.multi_reduction <add>, %15, %cst_10 [2] : vector<8x4x16xf32> to vector<8x4xf32>
    %c0_11 = arith.constant 0 : index
    %c0_12 = arith.constant 0 : index
    %17 = vector.load %arg7[%c0_11, %c0_12] : memref<8x4xf32, #tpu.memory_space<vmem>>, vector<8x4xf32>
    tpu.vector_store %arg7[%c0_11, %c0_12], %16 {strides = array<i32>} : memref<8x4xf32, #tpu.memory_space<vmem>>, vector<8x4xf32>,
    %c0_13 = arith.constant 0 : index
    %c0_14 = arith.constant 0 : index
    %18 = vector.load %arg5[%c0_13, %c0_14] : memref<8x64xf32, #tpu.memory_space<vmem>>, vector<8x64xf32>
    tpu.vector_store %arg5[%c0_13, %c0_14], %4 {strides = array<i32>} : memref<8x64xf32, #tpu.memory_space<vmem>>, vector<8x64xf32>,
    return
  }
  func.func @transform_0(%arg0: i32) -> (i32, i32) {
    %c0_i32 = arith.constant 0 : i32
    %c0_i32_0 = arith.constant 0 : i32
    return %arg0, %c0_i32 : i32, i32
  }
  func.func @transform_1(%arg0: i32) -> (i32, i32) {
    %c0_i32 = arith.constant 0 : i32
    %c0_i32_0 = arith.constant 0 : i32
    %c0_i32_1 = arith.constant 0 : i32
    return %c0_i32, %c0_i32_0 : i32, i32
  }
  func.func @transform_2(%arg0: i32) -> (i32, i32) {
    %c0_i32 = arith.constant 0 : i32
    %c0_i32_0 = arith.constant 0 : i32
    %c0_i32_1 = arith.constant 0 : i32
    return %c0_i32, %c0_i32_0 : i32, i32
  }
  func.func @transform_3(%arg0: i32) -> (i32, i32) {
    %c0_i32 = arith.constant 0 : i32
    %c0_i32_0 = arith.constant 0 : i32
    %c0_i32_1 = arith.constant 0 : i32
    return %c0_i32, %c0_i32_0 : i32, i32
  }
  func.func @transform_4(%arg0: i32) -> (i32, i32) {
    %c0_i32 = arith.constant 0 : i32
    %c0_i32_0 = arith.constant 0 : i32
    return %arg0, %c0_i32 : i32, i32
  }
  func.func @transform_5(%arg0: i32) -> (i32, i32) {
    %c0_i32 = arith.constant 0 : i32
    %c0_i32_0 = arith.constant 0 : i32
    return %arg0, %c0_i32 : i32, i32
  }
  func.func @transform_6(%arg0: i32) -> (i32, i32) {
    %c0_i32 = arith.constant 0 : i32
    %c0_i32_0 = arith.constant 0 : i32
    return %arg0, %c0_i32 : i32, i32
  }
}

</mosaic_0001>

<bundles_post_ra>
// kernel: tpu_custom_call.1
= control target key start
LH: loop header
LB: loop body
LE: loop exit
PB: predicated region body
PF: predicated region fallthrough
CT: control target
= control target key end

     0   :  { %12 = vsyncpa [#allocation3], 0  ;;  %s1291_s0 = inlined_call_operand.hbm [shape: f32[16,32], index: 0, kind: input, shape index: {}]   ;;  %s1292_s1 = inlined_call_operand.hbm [shape: f32[32,64], index: 1, kind: input, shape index: {}]   ;;  %s1293_s2 = inlined_call_operand.vmem [shape: f32[4,16], index: 2, kind: input, shape index: {}]   ;;  %s1294_s3 = inlined_call_operand.vmem [shape: f32[4,16], index: 3, kind: input, shape index: {}]   ;;  %s1295_s4 = inlined_call_operand.hbm [shape: f32[16,64], index: 4, kind: output, shape index: {0}]   ;;  %s1296_s5 = inlined_call_operand.vmem [shape: f32[16,4], index: 5, kind: output, shape index: {1}]   ;;  %s1297_s6 = inlined_call_operand.vmem [shape: f32[16,4], index: 6, kind: output, shape index: {2}]  }
   0x1   :  { %14 = vsyncpa [#allocation3 + $0x1], 0 }
   0x2   :  { %15 = vsyncpa [#allocation6], 0 }
   0x3   :  { %16 = vsyncpa [#allocation4], 0 }
   0x4   :  { %18 = vsyncpa [#allocation4 + $0x1], 0  ;;  %s1038_s21 = smov 0   ;;  %s1040_s22 = smov 0  }
   0x5   :  { %s1042_s23 = smov 0   ;;  %s1044_s24 = smov 0  }
   0x6 LB: > { %s1059_s25 = sadd.s32 4294967295, %s989_s24   ;;  %s767_s26 = sadd.s32 4294967294, %s989_s24   ;;  %s989_s24 = sphi %s1044_s24, %s1317_s24   ;;  %s985_s23 = sphi %s1042_s23, %s1316_s23   ;;  %s981_s22 = sphi %s1040_s22, %s1315_s22   ;;  %s977_s21 = sphi %s1038_s21, %s1314_s21  }
   0x7   : > { %p44_p0 = scmp.ne.s32.totalorder %s981_s22, %s977_s21  ;;  %p1298_p1 = scmp.eq.s32.totalorder %s1059_s25, 0 }
   0x8   : > { %p137_p3 = scmp.eq.s32.totalorder %s767_s26, 1  ;;  %p768_p5 = scmp.ge.s32.totalorder %s989_s24, 1 }
   0x9   : > { %p1068_p4 = por %p1298_p1, %p44_p0  ;;  %p196_p7 = scmp.lt.s32.totalorder %s989_s24, 3 }
   0xa   : > { %p1073_p6 = por %p137_p3, %p44_p0  ;;  %s991_s30 = smov [#allocation5]  }
   0xb   : > { %s1301_s27 = scalar_select %p1068_p4, 1, 0 }
   0xc   : > { %s1302_s28 = scalar_select %p1073_p6, 1, 0 }
   0xd   : > { %p1078_p8 = pnand %p768_p5, %p196_p7  ;;  %s208_s7 = sshll.u32 %s991_s30, 4  ;;  %s1082_s7 = int_to_ptr.vmem [resolvable:$true] %s208_s7 }
   0xe   : > { %s1094_s9 = sadd.s32 1, %s989_s24   ;;  %s31_s10 = sadd.s32 1, %s985_s23 }
   0xf   : > { %s1303_s29 = scalar_select %p1078_p8, 1, 0 }
  0x10   : > { %p803_p9 = pneg %p1078_p8  ;;  %s28_s11 = ssub.s32 %s989_s24, %s1094_s9 }
  0x11   : > { %s861_s14 = scalar_lea.hbm %s1292_s1, 512 }
  0x12   : > { %p1089_p11 = pnand %p803_p9, %p1298_p1  ;;  %p862_p12 = scmp.ne.s32.totalorder %s1292_s1, %s861_s14 }
  0x13   : > { %p868_p5 = scmp.lt.u32.totalorder %s861_s14, %s1292_s1 }
  0x14   : > { %p863_p13 = pneg %p1089_p11 }
  0x16   : > { %p864_p0 = pnand %p863_p13, %p862_p12 }
  0x18   : > { %p865_p3 = pneg %p864_p0 }
  0x1a   : > { %p870_p7 = pnand %p868_p5, %p865_p3 }
  0x1c   : > { %873 = shalt.err (!%p870_p7)
}
  0x1d   : > { %s874_s19 = scalar_lea.vmem %s1082_s7, 512  ;;  %p882_p2 = scmp.lt.s32.totalorder %s1082_s7, %s1082_s7 }
  0x1e   : > { %p875_p9 = scmp.ne.s32.totalorder %s1082_s7, %s874_s19  ;;  %p883_p6 = scmp.lt.s32.totalorder %s874_s19, %s874_s19 }
  0x20   : > { %p877_p10 = pnand %p875_p9, %p863_p13  ;;  %p884_p4 = por %p883_p6, %p882_p2 }
  0x22   : > { %p878_p1 = pneg %p877_p10 }
  0x24   : > { %p885_p8 = pnand %p884_p4, %p878_p1 }
  0x26   : > { %888 = shalt.err (!%p885_p8)
}
  0x27   : > { %s992_s20 = smov 128   ;;  %s993_s26 = smov 8  }
  0x28   : > { %806 = dma.hbm_to_vmem [thread:$0]  (!%p1089_p11), %s1292_s1, 512, %s1082_s7, [#allocation6], %s992_s20, %s992_s20, %s993_s26  }
  0x29   : > { %p29_p2 = scmp.eq.s32.totalorder %s28_s11, 0  ;;  %p38_p1 = scmp.ne.s32.totalorder %s985_s23, %s981_s22 }
  0x2a   : > { %p39_p4 = scmp.eq.s32.totalorder %s989_s24, 0  ;;  %p816_p6 = scmp.lt.s32.totalorder %s989_s24, 2 }
  0x2b   : > { %s1125_s13 = scalar_select %p29_p2, %s985_s23, %s31_s10  }
  0x2c   : > { %p40_p8 = por %p39_p4, %p38_p1  ;;  %p1305_p10 = scmp.eq.s32.totalorder %s1059_s25, 1 }
  0x2d   : > { %s228_s15 = sand.u32 1, %s985_s23   ;;  %s772_s16 = sshll.u32 %s989_s24, 7 }
  0x2e   : > { %p1129_p12 = por %p1305_p10, %p38_p1  ;;  %s771_s17 = sshll.u32 %s228_s15, 3 }
  0x2f   : > { %s1138_s19 = scalar_lea.hbm %s1291_s0, %s772_s16  ;;  %s232_s7 = scalar_lea.vmem [#allocation2], %s771_s17 }
  0x30   : > { %s239_s10 = sshll.u32 %s232_s7, 4  ;;  %p1140_p11 = pnand %p816_p6, %p40_p8  ;;  %s1144_s10 = int_to_ptr.vmem [resolvable:$true] %s239_s10 }
  0x31   : > { %s229_s20 = scalar_lea.sflag [#allocation3], %s228_s15  ;;  %s889_s26 = scalar_lea.hbm %s1138_s19, 128 }
  0x32   : > { %p890_p13 = scmp.ne.s32.totalorder %s1138_s19, %s889_s26  ;;  %p891_p0 = pneg %p1140_p11 }
  0x33   : > { %s894_s16 = scalar_lea.hbm %s1291_s0, 256  ;;  %p895_p7 = scmp.lt.u32.totalorder %s1138_s19, %s1291_s0 }
  0x34   : > { %p892_p3 = pnand %p891_p0, %p890_p13  ;;  %p896_p9 = scmp.lt.u32.totalorder %s894_s16, %s889_s26 }
  0x35   : > { %p898_p1 = scmp.lt.u32.totalorder %s889_s26, %s1138_s19 }
  0x36   : > { %p893_p5 = pneg %p892_p3  ;;  %p897_p2 = por %p896_p9, %p895_p7 }
  0x38   : > { %p899_p4 = por %p898_p1, %p897_p2 }
  0x3a   : > { %p900_p6 = pnand %p899_p4, %p893_p5 }
  0x3c   : > { %903 = shalt.err (!%p900_p6)
}
  0x3d   : > { %s904_s15 = scalar_lea.vmem %s1144_s10, 128  ;;  %s994_s18 = smov [#allocation2]  }
  0x3e   : > { %p905_p8 = scmp.ne.s32.totalorder %s1144_s10, %s904_s15  ;;  %s909_s7 = sshll.u32 %s994_s18, 4  ;;  %s910_s7 = int_to_ptr.vmem [resolvable:$false] %s909_s7 }
  0x3f   : > { %s911_s30 = scalar_lea.vmem %s910_s7, 256  ;;  %p912_p3 = scmp.lt.s32.totalorder %s1144_s10, %s910_s7 }
  0x40   : > { %p907_p10 = pnand %p905_p8, %p891_p0  ;;  %p913_p7 = scmp.lt.s32.totalorder %s911_s30, %s904_s15 }
  0x42   : > { %p908_p13 = pneg %p907_p10  ;;  %p914_p9 = por %p913_p7, %p912_p3 }
  0x44   : > { %p915_p2 = pnand %p914_p9, %p908_p13 }
  0x46   : > { %918 = shalt.err (!%p915_p2)
}
  0x47   : > { %810 = dma.hbm_to_vmem [thread:$0]  (!%p1140_p11), %s1138_s19, 128, %s1144_s10, %s229_s20  }
  0x48   : > { %p1308_p5 = scmp.ne.s32.totalorder %s1303_s29, 0 }
  0x49   : > { %s1174_s26 = sand.u32 (!%p1308_p5), 1, %s981_s22   ;;  %p1309_p0 = scmp.ne.s32.totalorder (!%p1308_p5), %s1301_s27, 0 }
  0x4a   : > { %248 = sbr.rel (%p1308_p5) target bundleno = 611 (0x263), region = 36  ;;  %s774_s12 = sshll.u32 (!%p1308_p5), %s1174_s26, 3 }
  0x4b   : > { %s251_s16 = scalar_lea.sflag (!%p1308_p5), [#allocation3], %s1174_s26  ;;  %s254_s17 = scalar_lea.vmem (!%p1308_p5), [#allocation2], %s774_s12 }
  0x51   : > { %964 = dma.done.wait (%p1309_p0), %s251_s16, 128  }
  0x52   : > { %966 = vsyncadd (%p1309_p0), %s251_s16, 4294967168  ;;  %p1310_p11 = scmp.eq.s32.totalorder %s1059_s25, 0 }
  0x54   : > { %968 = dma.done.wait (%p1310_p11), [#allocation6], 512   ;;  %p1311_p1 = pmov %p1310_p11 }
  0x55   : > { %v995_v0 = vmov 0.0   ;;  %vm996_vm0 = vmmov 0   ;;  %v304_v1 = vld [vmem:[#allocation5] sm:$0xff]  ;;  %v305_v2 = vld [vmem:[#allocation5 + $0x8] sm:$0xff]  ;;  %v306_v3 = vld [vmem:[#allocation5 + $0x10] sm:$0xff]  ;;  %vm312_vm1 = vcmask 261120   ;;  %v371_v9 = vlaneseq }
  0x56   : > { %970 = vsyncadd (%p1311_p1), [#allocation6], 4294966784  ;;  %787 = vmatprep.subr.bf16.mxu0 %v995_v0  ;;  %791 = vmatprep.mubr.msk.bf16.mxu0 %vm996_vm0, %v995_v0  ;;  %v308_v4 = vpack.c.bf16 %v305_v2, %v304_v1  ;;  %v307_v5 = vld [vmem:[#allocation5 + $0x18] sm:$0xff]  ;;  %vm609_vm2 = vcmask 523264   ;;  %s997_s27 = smov 80   ;;  %s998_s29 = smov 112  }
  0x57   : > { %v309_v6 = vpack.c.bf16 %v307_v5, %v306_v3  ;;  %v310_v7 = vld [vmem:[%s254_s17] sm:$0xff]  ;;  %v372_v10 = vshrl.u32 %v371_v9, 7  ;;  %v477_v11 = vand.u32 127, %v371_v9  ;;  %s1195_s19 = scalar_lea.vmem [#allocation7], %s774_s12  ;;  %s999_s10 = smov 96   ;;  %vm443_vm3 = vcmask 125952  }
  0x58   : > { %788 = vmatpush3.bf16.msra.mxu0 %v308_v4  ;;  %v311_v8 = vpack.c.bf16 %v310_v7, %v310_v7  ;;  %v1000_v17 = vmov 1983009808   ;;  %v1001_v20 = vmov 1934713408   ;;  %v527_v39 = vld [vmem:[%s1294_s3] sm:$0xf] }
  0x59   : > { %789 = vmatprep.subr.bf16.mxu0 %v995_v0  ;;  %v1191_v12 = vsub.s32 %v477_v11, %v372_v10  ;;  %v369_v18 = vunpack.c.l.s4 %v1000_v17  ;;  %v401_v21 = vunpack.c.l.s4 %v1001_v20  ;;  %v434_v40 = vld [vmem:[%s1293_s2] sm:$0xf]  ;;  %s781_s18 = sshll.u32 %s1059_s25, 7  ;;  %s633_s16 = sshll.u32 %s1195_s19, 4  ;;  %s634_s16 = int_to_ptr.vmem [resolvable:$true] %s633_s16 }
  0x5a   : > { %s1228_s12 = scalar_lea.hbm %s1295_s4, %s781_s18  ;;  %s612_s17 = scalar_lea.sflag [#allocation4], %s1174_s26 }
  0x5b   : > { %v370_v19 = vunpack.c.0.s8 %v369_v18  ;;  %v402_v26 = vunpack.c.0.s8 %v401_v21 }
  0x5c   : > { %790 = vmatpush3.bf16.msra.mxu0 %v309_v6 }
  0x5d   : > { %v373_v24 = vsub.s32 %v370_v19, %v372_v10  ;;  %v405_v34 = vsub.s32 %v402_v26, %v372_v10 }
  0x5f   : > { %792 = vmatmul.mubr.msk.bf16.vlgmr.msra.gmra.mrb[0].mxu0 %vm312_vm1, %v311_v8 }
 0x132   : > { %v350_v13 = vpop.f32.mrb[0].mxu0 }
 0x133   : > { %363 = vrot.lane.b32.xlu1 %v350_v13, %s997_s27  ;;  %357 = vrot.lane.b32.xlu0 %v350_v13, %s998_s29  ;;  %v793_v14 = vpop.f32.mrb[1].mxu0  ;;  %610 = vst.msk [vmem:[%s1195_s19] sm:$0xff] %vm609_vm2, %v350_v13  ;;  %s919_s27 = scalar_lea.vmem %s634_s16, 128  ;;  %s1002_s29 = smov [#allocation7]  }
 0x134   : > { %v353_v15 = vpop.f32.mrb[2].mxu0  ;;  %p920_p4 = scmp.ne.s32.totalorder %s634_s16, %s919_s27 }
 0x135   : > { %v794_v16 = vpop.f32.mrb[3].mxu0 }
 0x136   : > { %p921_p6 = pnand %p920_p4, %p1129_p12 }
 0x137   : > { %360 = vrot.lane.b32.xlu0 %v350_v13, %s999_s10  ;;  %s923_s10 = sshll.u32 %s1002_s29, 4  ;;  %s924_s10 = int_to_ptr.vmem [resolvable:$false] %s923_s10 }
 0x138   : > { %p922_p8 = pneg %p921_p6  ;;  %s925_s11 = scalar_lea.vmem %s924_s10, 256 }
 0x139   : > { %p926_p10 = scmp.lt.s32.totalorder %s634_s16, %s924_s10  ;;  %p927_p13 = scmp.lt.s32.totalorder %s925_s11, %s919_s27 }
 0x13b   : > { %p928_p3 = por %p927_p13, %p926_p10 }
 0x13d   : > { %p929_p7 = pnand %p928_p3, %p922_p8 }
 0x1a5   : > { %v364_v22 = vpop.permute.xlu1 %363  ;;  %v358_v23 = vpop.permute.xlu0 %357 }
 0x1a6   : > { %v382_v25 = vcombine.low %v358_v23, %v364_v22  ;;  %v383_v27 = vcombine.high %v358_v23, %v364_v22 }
 0x1a8   : > { %v390_v31 = vrot.slane %v382_v25, %v373_v24  ;;  %v397_v35 = vrot.slane %v383_v27, %v373_v24 }
 0x1a9   : > { %v361_v28 = vpop.permute.xlu0 %360 }
 0x1aa   : > { %v366_v29 = vcombine.low %v350_v13, %v361_v28  ;;  %v367_v30 = vcombine.high %v350_v13, %v361_v28 }
 0x1ac   : > { %v374_v32 = vrot.slane %v366_v29, %v373_v24  ;;  %v381_v33 = vrot.slane %v367_v30, %v373_v24 }
 0x1ae   : > { %v398_v36 = vcombine.low %v374_v32, %v390_v31  ;;  %v399_v37 = vcombine.high %v374_v32, %v390_v31  ;;  %v414_v38 = vcombine.low %v381_v33, %v397_v35  ;;  %v415_v45 = vcombine.high %v381_v33, %v397_v35 }
 0x1b0   : > { %v406_v41 = vrot.slane %v398_v36, %v405_v34  ;;  %v413_v42 = vrot.slane %v399_v37, %v405_v34  ;;  %v422_v46 = vrot.slane %v414_v38, %v405_v34  ;;  %v429_v51 = vrot.slane %v415_v45, %v405_v34 }
 0x1b2   : > { %v528_v43 = vmul.f32 %v527_v39, %v406_v41  ;;  %v435_v44 = vmul.f32 %v434_v40, %v406_v41  ;;  %v437_v49 = vmul.f32 %v434_v40, %v413_v42  ;;  %v530_v50 = vmul.f32 %v527_v39, %v413_v42 }
 0x1b3   : > { %v439_v54 = vmul.f32 %v434_v40, %v422_v46  ;;  %v532_v55 = vmul.f32 %v527_v39, %v422_v46  ;;  %v441_v56 = vmul.f32 %v434_v40, %v429_v51  ;;  %v534_v59 = vmul.f32 %v527_v39, %v429_v51 }
 0x1b4   : > { %v536_v47 = vsel %vm443_vm3, %v528_v43, 0.0  ;;  %v444_v48 = vsel %vm443_vm3, %v435_v44, 0.0  ;;  %v450_v52 = vsel %vm443_vm3, %v437_v49, 0.0  ;;  %v542_v53 = vsel %vm443_vm3, %v530_v50, 0.0 }
 0x1b5   : > { %537 = vadd.xlane.f32.xlu0 %v536_v47  ;;  %445 = vadd.xlane.f32.xlu1 %v444_v48  ;;  %v456_v57 = vsel %vm443_vm3, %v439_v54, 0.0  ;;  %v548_v58 = vsel %vm443_vm3, %v532_v55, 0.0  ;;  %v430_v60 = vcombine.high %v406_v41, %v995_v0  ;;  %v462_v61 = vsel %vm443_vm3, %v441_v56, 0.0 }
 0x1b6   : > { %v554_v62 = vsel %vm443_vm3, %v534_v59, 0.0  ;;  %v431_v2 = vcombine.high %v413_v42, %v995_v0  ;;  %v432_v3 = vcombine.high %v422_v46, %v995_v0  ;;  %v433_v8 = vcombine.high %v429_v51, %v995_v0 }
 0x1b7   : > { %v529_v63 = vmul.f32 %v527_v39, %v430_v60  ;;  %v436_v1 = vmul.f32 %v434_v40, %v430_v60 }
 0x1b8   : > { %v531_v6 = vmul.f32 %v527_v39, %v431_v2  ;;  %v438_v7 = vmul.f32 %v434_v40, %v431_v2  ;;  %v533_v11 = vmul.f32 %v527_v39, %v432_v3  ;;  %v440_v13 = vmul.f32 %v434_v40, %v432_v3 }
 0x1b9   : > { %451 = vadd.xlane.f32.xlu0 %v450_v52  ;;  %543 = vadd.xlane.f32.xlu1 %v542_v53  ;;  %v539_v4 = vsel %vm443_vm3, %v529_v63, 0.0  ;;  %v447_v5 = vsel %vm443_vm3, %v436_v1, 0.0  ;;  %v535_v16 = vmul.f32 %v527_v39, %v433_v8  ;;  %v442_v17 = vmul.f32 %v434_v40, %v433_v8 }
 0x1ba   : > { %v545_v9 = vsel %vm443_vm3, %v531_v6, 0.0  ;;  %v453_v10 = vsel %vm443_vm3, %v438_v7, 0.0  ;;  %v551_v14 = vsel %vm443_vm3, %v533_v11, 0.0  ;;  %v459_v15 = vsel %vm443_vm3, %v440_v13, 0.0 }
 0x1bb   : > { %v557_v0 = vsel %vm443_vm3, %v535_v16, 0.0  ;;  %v465_v18 = vsel %vm443_vm3, %v442_v17, 0.0 }
 0x1bd   : > { %457 = vadd.xlane.f32.xlu0 %v456_v57  ;;  %549 = vadd.xlane.f32.xlu1 %v548_v58 }
 0x1c1   : > { %463 = vadd.xlane.f32.xlu0 %v462_v61  ;;  %555 = vadd.xlane.f32.xlu1 %v554_v62 }
 0x1c5   : > { %540 = vadd.xlane.f32.xlu1 %v539_v4  ;;  %448 = vadd.xlane.f32.xlu0 %v447_v5 }
 0x1c9   : > { %546 = vadd.xlane.f32.xlu1 %v545_v9  ;;  %454 = vadd.xlane.f32.xlu0 %v453_v10 }
 0x1cd   : > { %552 = vadd.xlane.f32.xlu1 %v551_v14  ;;  %460 = vadd.xlane.f32.xlu0 %v459_v15 }
 0x1d1   : > { %558 = vadd.xlane.f32.xlu1 %v557_v0  ;;  %466 = vadd.xlane.f32.xlu0 %v465_v18 }
 0x1d2   : > { %932 = shalt.err (!%p929_p7)
}
 0x1d3   : > { %s933_s26 = scalar_lea.hbm %s1228_s12, 128  ;;  %s937_s8 = scalar_lea.hbm %s1295_s4, 256 }
 0x1d4   : > { %p934_p9 = scmp.ne.s32.totalorder %s1228_s12, %s933_s26  ;;  %p938_p0 = scmp.lt.u32.totalorder %s1228_s12, %s1295_s4 }
 0x1d5   : > { %p939_p11 = scmp.lt.u32.totalorder %s937_s8, %s933_s26  ;;  %p941_p4 = scmp.lt.u32.totalorder %s933_s26, %s1228_s12 }
 0x1d6   : > { %p935_p2 = pnand %p934_p9, %p1129_p12 }
 0x1d7   : > { %p940_p1 = por %p939_p11, %p938_p0 }
 0x1d8   : > { %p936_p5 = pneg %p935_p2 }
 0x1d9   : > { %p942_p6 = por %p941_p4, %p940_p1 }
 0x1db   : > { %p943_p8 = pnand %p942_p6, %p936_p5 }
 0x1dd   : > { %946 = shalt.err (!%p943_p8)
}
 0x1de   : > { %801 = dma.vmem_to_hbm [thread:$0]  (%p1129_p12), %s634_s16, 128, %s1228_s12, %s612_s17   ;;  %vm510_vm4 = vcmask 1041409   ;;  %vm512_vm5 = vcmask 1042434   ;;  %vm514_vm6 = vcmask 1043459   ;;  %vm516_vm7 = vcmask 1044484  }
 0x1df   : > { %p295_p12 = scmp.lt.s32.totalorder %s1059_s25, 1  ;;  %vm518_vm8 = vcmask 1045509   ;;  %vm520_vm9 = vcmask 1046534   ;;  %vm522_vm10 = vcmask 1047559   ;;  %vm525_vm11 = vcmask 31744  }
 0x1e1   : > { %s1319_s25 = smov (!%p295_p12, %s1059_s25), 1 }
 0x1e2   : > { %s777_s14 = sshll.u32 %s1319_s25, 3 }
 0x1e3   : > { %s302_s12 = scalar_lea.vmem %s1297_s6, %s777_s14  ;;  %s298_s25 = scalar_lea.vmem %s1296_s5, %s777_s14 }
 0x242   : > { %v538_v19 = vpop.xlane.xlu0 %537  ;;  %v446_v20 = vpop.xlane.xlu1 %445 }
 0x243   : > { %v571_v29 = vrot.slane %v538_v19, %v1191_v12  ;;  %v481_v30 = vrot.slane %v446_v20, %v1191_v12 }
 0x246   : > { %v452_v21 = vpop.xlane.xlu0 %451  ;;  %v544_v22 = vpop.xlane.xlu1 %543 }
 0x247   : > { %v489_v35 = vrot.slane %v452_v21, %v1191_v12  ;;  %v579_v36 = vrot.slane %v544_v22, %v1191_v12 }
 0x24a   : > { %v458_v23 = vpop.xlane.xlu0 %457  ;;  %v550_v24 = vpop.xlane.xlu1 %549 }
 0x24b   : > { %v497_v45 = vrot.slane %v458_v23, %v1191_v12  ;;  %v587_v46 = vrot.slane %v550_v24, %v1191_v12 }
 0x24e   : > { %v464_v25 = vpop.xlane.xlu0 %463  ;;  %v556_v26 = vpop.xlane.xlu1 %555 }
 0x24f   : > { %v505_v55 = vrot.slane %v464_v25, %v1191_v12  ;;  %v595_v56 = vrot.slane %v556_v26, %v1191_v12 }
 0x252   : > { %v541_v27 = vpop.xlane.xlu1 %540  ;;  %v449_v28 = vpop.xlane.xlu0 %448 }
 0x253   : > { %v575_v31 = vrot.slane %v541_v27, %v1191_v12  ;;  %v485_v32 = vrot.slane %v449_v28, %v1191_v12 }
 0x255   : > { %v600_v33 = vsel %vm510_vm4, %v575_v31, %v571_v29  ;;  %v511_v34 = vsel %vm510_vm4, %v485_v32, %v481_v30 }
 0x256   : > { %v547_v37 = vpop.xlane.xlu1 %546  ;;  %v455_v38 = vpop.xlane.xlu0 %454  ;;  %v601_v41 = vsel %vm512_vm5, %v579_v36, %v600_v33  ;;  %v513_v42 = vsel %vm512_vm5, %v489_v35, %v511_v34 }
 0x257   : > { %v583_v39 = vrot.slane %v547_v37, %v1191_v12  ;;  %v493_v40 = vrot.slane %v455_v38, %v1191_v12 }
 0x259   : > { %v602_v43 = vsel %vm514_vm6, %v583_v39, %v601_v41  ;;  %v515_v44 = vsel %vm514_vm6, %v493_v40, %v513_v42 }
 0x25a   : > { %v553_v47 = vpop.xlane.xlu1 %552  ;;  %v461_v48 = vpop.xlane.xlu0 %460  ;;  %v603_v51 = vsel %vm516_vm7, %v587_v46, %v602_v43  ;;  %v517_v52 = vsel %vm516_vm7, %v497_v45, %v515_v44 }
 0x25b   : > { %v591_v49 = vrot.slane %v553_v47, %v1191_v12  ;;  %v501_v50 = vrot.slane %v461_v48, %v1191_v12 }
 0x25d   : > { %v604_v53 = vsel %vm518_vm8, %v591_v49, %v603_v51  ;;  %v519_v54 = vsel %vm518_vm8, %v501_v50, %v517_v52 }
 0x25e   : > { %v559_v57 = vpop.xlane.xlu1 %558  ;;  %v467_v58 = vpop.xlane.xlu0 %466  ;;  %v605_v61 = vsel %vm520_vm9, %v595_v56, %v604_v53  ;;  %v521_v62 = vsel %vm520_vm9, %v505_v55, %v519_v54 }
 0x25f   : > { %v599_v59 = vrot.slane %v559_v57, %v1191_v12  ;;  %v509_v60 = vrot.slane %v467_v58, %v1191_v12 }
 0x261   : > { %v606_v63 = vsel %vm522_vm10, %v599_v59, %v605_v61  ;;  %v523_v1 = vsel %vm522_vm10, %v509_v60, %v521_v62 }
 0x262   : > { %608 = vst.msk [vmem:[%s302_s12] sm:$0xff] %vm525_vm11, %v606_v63  ;;  %526 = vst.msk [vmem:[%s298_s25] sm:$0xff] %vm525_vm11, %v523_v1 }
 0x263 PF: > { %s651_s27 = sand.u32 1, %s977_s21   ;;  %p1312_p10 = scmp.ne.s32.totalorder %s1302_s28, 0 }
 0x264   : > { %p1313_p13 = scmp.ge.s32.totalorder %s989_s24, 2  ;;  %s652_s29 = scalar_lea.sflag [#allocation4], %s651_s27 }
 0x266   : > { %p812_p3 = pnand %p1313_p13, %p1312_p10 }
 0x268   : > { %972 = dma.done.wait (!%p812_p3), %s652_s29, 128  }
 0x269   : > { %974 = vsyncadd (!%p812_p3), %s652_s29, 4294967168  ;;  %p21_p7 = scmp.ge.s32.totalorder %s1094_s9, 4   ;;  %s1314_s21 = smov %s981_s22 }
 0x26a   : > { %s1315_s22 = smov %s985_s23  ;;  %s1316_s23 = smov %s1125_s13 }
 0x26b   : > { %s1317_s24 = smov %s1094_s9  ;;  %23 = sbr.rel (!%p21_p7) target bundleno = 6 (0x6), region = 109 }
 0x272   :  { %671 = vsyncpa [#allocation3], 1 }
 0x273   :  { %673 = vsyncpa [#allocation3 + $0x1], 1 }
 0x274   :  { %674 = vsyncpa [#allocation6], 1 }
 0x275   :  { %675 = vsyncpa [#allocation4], 1 }
 0x276   :  { %677 = vsyncpa [#allocation4 + $0x1], 1 }

</bundles_post_ra>
